<compile_context>
chip_gen: v7x
topology: tpu7x:2x2x1
jax: 0.10.0
libtpu: 0.0.40
codegen_flags: <defaults>
</compile_context>

<pallas_src>
import functools

import jax
import jax.numpy as jnp
from jax.experimental import pallas as pl
from jax.experimental.pallas import tpu as pltpu

EPS = 1e-6  # torch.nn.functional.pairwise_distance default


def _round_up(x, m):
    return ((x + m - 1) // m) * m


def _vmem_capacity_bytes():
    """Physical VMEM per TensorCore (64 MiB on v7x, 128 MiB on v5e/v6e)."""
    try:
        cap = int(getattr(pltpu.get_tpu_info(), "vmem_capacity_bytes", 0))
        if cap > 0:
            return cap
    except Exception:
        pass
    return 64 * 1024 * 1024  # conservative (v7x-sized) fallback: safe on every generation


# ---------------------------------------------------------------------------
# Kernel 1: single feature pass (n_d == 1).  Covers D <= 4096, including the
# lane-packed small-D layout (`groups` consecutive original rows per 128-lane row).
# ---------------------------------------------------------------------------
def _rkd_single_pass_kernel(s_ref, t_ref, o_ref, *, n_rows, tile_rows, group_d,
                            groups, mask_rows):
    r = pl.program_id(0)

    diff = s_ref[...].astype(jnp.float32) - t_ref[...].astype(jnp.float32) + EPS
    sq = diff * diff                                     # (tile_rows, groups*group_d), dense

    # Per-original-row squared norm -> distance.  `groups` is a tiny static int
    # (1 for the un-packed layout), so this loop is fully unrolled; slices are static.
    row_dist = None
    for g in range(groups):
        gs = jnp.sum(sq[:, g * group_d:(g + 1) * group_d], axis=-1, keepdims=True)
        dg = jnp.sqrt(gs)                                # (tile_rows, 1)
        row_dist = dg if row_dist is None else row_dist + dg

    if mask_rows:
        # Last row tile may extend past the (packed) row count: zero the padded rows.
        # where() selects 0.0 for padded rows, so garbage/NaN in them cannot propagate.
        row = r * tile_rows + jax.lax.broadcasted_iota(jnp.int32, (tile_rows, 1), 0)
        row_dist = jnp.where(row < n_rows, row_dist, 0.0)

    # Single cross-sublane reduce per row tile.
    o_ref[...] = jnp.sum(row_dist, axis=0, keepdims=True).reshape(1, 1, 1)


# ---------------------------------------------------------------------------
# Kernel 2: multiple feature passes (n_d > 1, i.e. D > tile_d).  A (tile_rows, 128)
# f32 VMEM scratch carries lane-chunk partial squared norms across d steps with plain
# vector adds; the 128->1 cross-lane reduce + sqrt + row reduce happen once, in the
# epilogue.  The column mask is only applied on the final d step.
# ---------------------------------------------------------------------------
def _rkd_multi_pass_kernel(s_ref, t_ref, o_ref, sq_ref, *, n_rows, n_cols,
                           tile_rows, tile_d, n_d, mask_rows, mask_cols):
    r = pl.program_id(0)
    d = pl.program_id(1)

    @pl.when(d == 0)
    def _():
        sq_ref[...] = jnp.zeros_like(sq_ref)

    def accumulate(diff):
        sq = diff * diff                                 # (tile_rows, tile_d)
        acc = sq[:, 0:128]
        for c in range(1, tile_d // 128):                # static unroll, vreg-aligned slices
            acc = acc + sq[:, c * 128:(c + 1) * 128]
        sq_ref[...] += acc                               # plain vector adds, no per-step XLU reduce

    diff = s_ref[...].astype(jnp.float32) - t_ref[...].astype(jnp.float32) + EPS

    if mask_cols:
        # Only the LAST feature tile has padded columns: keep the cheap path elsewhere.
        @pl.when(d == n_d - 1)
        def _():
            col = d * tile_d + jax.lax.broadcasted_iota(jnp.int32, (1, tile_d), 1)
            accumulate(jnp.where(col < n_cols, diff, 0.0))

        @pl.when(d < n_d - 1)
        def _():
            accumulate(diff)
    else:
        accumulate(diff)

    @pl.when(d == n_d - 1)
    def _():
        sq_row = jnp.sum(sq_ref[...], axis=-1, keepdims=True)   # (tile_rows, 1)
        dist = jnp.sqrt(sq_row)
        if mask_rows:
            row = r * tile_rows + jax.lax.broadcasted_iota(jnp.int32, (tile_rows, 1), 0)
            dist = jnp.where(row < n_rows, dist, 0.0)
        o_ref[...] = jnp.sum(dist, axis=0, keepdims=True).reshape(1, 1, 1)


def rkd_distance_loss(student, teacher, *, tile_rows=None, tile_d=None,
                      vmem_budget_bytes=None):
    """Pallas TPU implementation of F.pairwise_distance(student, teacher).mean().

    Math is performed in float32 regardless of input dtype.  The kernel is purely
    HBM-bandwidth bound, so passing bf16 student/teacher halves traffic (~2x faster)
    with negligible accuracy impact.  Returns a float32 scalar.
    """
    assert student.shape == teacher.shape, "student/teacher must match in shape"
    assert student.dtype == teacher.dtype, "student/teacher must match in dtype"

    D = int(student.shape[-1])
    N = 1
    for dim in student.shape[:-1]:
        N *= int(dim)
    s2 = student.reshape(N, D)
    t2 = teacher.reshape(N, D)
    itemsize = jnp.dtype(student.dtype).itemsize
    row_align = max(8, 32 // itemsize)          # sublane granularity: 8 f32 / 16 bf16 / 32 int8

    # ---- generation-aware VMEM budgeting (64 MiB physical on v7x, 128 MiB on v5e/v6e) ----
    cap = _vmem_capacity_bytes()
    if vmem_budget_bytes is None:
        vmem_budget_bytes = (64 * 1024 * 1024 if cap >= 96 * 1024 * 1024
                             else 28 * 1024 * 1024)
    vmem_budget_bytes = max(4 * 1024 * 1024,
                            min(int(vmem_budget_bytes), cap - 16 * 1024 * 1024))

    # ---- lane-dense packing for small D (e.g. the module's D=32 embeddings) ----
    # (N, D) -> (N/G, 128) is a free, bitcast-compatible reshape; otherwise D=32 f32 wastes
    # 75% of the VPU work on lane padding (can become the binding slot at v7x's 3.2 TB/s).
    groups = 1
    R, width = N, D
    if 8 <= D < 128 and 128 % D == 0 and N % (128 // D) == 0:
        groups = 128 // D
        R = N // groups
        width = 128
        s2 = s2.reshape(R, width)
        t2 = t2.reshape(R, width)

    # ---- feature (lane) axis tiling ----
    if groups > 1:
        eff_tile_d, n_d = width, 1
    else:
        TILE_D_MAX = 4096                        # multiple of 128
        if tile_d is None:
            eff_tile_d = D if D <= TILE_D_MAX else TILE_D_MAX
        else:
            eff_tile_d = min(int(tile_d), D)
            if eff_tile_d < D:                   # column tiling must be vreg (128) aligned
                eff_tile_d = max(128, (eff_tile_d // 128) * 128)
        if eff_tile_d >= D:
            eff_tile_d = D
        n_d = pl.cdiv(D, eff_tile_d)
    multi_d = n_d > 1

    # ---- row (sublane) axis tiling, sized to the double-buffered VMEM budget ----
    lane_padded_w = _round_up(eff_tile_d, 128)
    bytes_per_row = 4 * lane_padded_w * itemsize + (128 * 4 if multi_d else 0)
    max_rows = max(row_align,
                   ((vmem_budget_bytes // bytes_per_row) // row_align) * row_align)
    if tile_rows is None:
        if R <= row_align:
            eff_tile_rows = R                    # full-extent block is always legal
        else:
            # >= 2 row tiles so v7x's second TensorCore gets work on the "parallel" axis.
            eff_tile_rows = min(max_rows, _round_up(pl.cdiv(R, 2), row_align))
    else:
        eff_tile_rows = min(int(tile_rows), R)
        if eff_tile_rows != R:
            eff_tile_rows = max(row_align, (eff_tile_rows // row_align) * row_align)
    n_rt = pl.cdiv(R, eff_tile_rows)

    mask_rows = (n_rt * eff_tile_rows != R)
    mask_cols = multi_d and (n_d * eff_tile_d != D)

    # ---- explicit VMEM limit: double-buffered inputs + scratch, clamped to physical ----
    padded_rows = _round_up(eff_tile_rows, row_align)
    footprint = 4 * padded_rows * lane_padded_w * itemsize
    if multi_d:
        footprint += padded_rows * 128 * 4
    vmem_limit_bytes = int(min(footprint + 8 * 1024 * 1024, cap - 4 * 1024 * 1024))

    cost = pl.CostEstimate(flops=4 * N * D, transcendentals=N,
                           bytes_accessed=2 * N * D * itemsize + n_rt * 4)

    if multi_d:
        kernel = functools.partial(
            _rkd_multi_pass_kernel, n_rows=R, n_cols=D, tile_rows=eff_tile_rows,
            tile_d=eff_tile_d, n_d=n_d, mask_rows=mask_rows, mask_cols=mask_cols)
        grid = (n_rt, n_d)
        in_specs = [pl.BlockSpec((eff_tile_rows, eff_tile_d), lambda r, d: (r, d)),
                    pl.BlockSpec((eff_tile_rows, eff_tile_d), lambda r, d: (r, d))]
        out_specs = pl.BlockSpec((1, 1, 1), lambda r, d: (r, 0, 0))
        scratch_shapes = [pltpu.VMEM((eff_tile_rows, 128), jnp.float32)]
        dim_sem = ("parallel", "arbitrary")
    else:
        kernel = functools.partial(
            _rkd_single_pass_kernel, n_rows=R, tile_rows=eff_tile_rows,
            group_d=width // groups, groups=groups, mask_rows=mask_rows)
        grid = (n_rt,)
        in_specs = [pl.BlockSpec((eff_tile_rows, width), lambda r: (r, 0)),
                    pl.BlockSpec((eff_tile_rows, width), lambda r: (r, 0))]
        out_specs = pl.BlockSpec((1, 1, 1), lambda r: (r, 0, 0))
        scratch_shapes = []
        dim_sem = ("parallel",)

    partials = pl.pallas_call(
        kernel,
        out_shape=jax.ShapeDtypeStruct((n_rt, 1, 1), jnp.float32),
        grid_spec=pltpu.PrefetchScalarGridSpec(
            num_scalar_prefetch=0,
            grid=grid,
            in_specs=in_specs,
            out_specs=out_specs,
            scratch_shapes=scratch_shapes),
        compiler_params=pltpu.CompilerParams(
            dimension_semantics=dim_sem,
            vmem_limit_bytes=vmem_limit_bytes),
        cost_estimate=cost,
    )(s2, t2)

    return jnp.sum(partials) / N


def _reference(student, teacher):
    """Pure-JAX reference matching F.pairwise_distance(student, teacher).mean()."""
    D = student.shape[-1]
    s = student.reshape(-1, D).astype(jnp.float32)
    t = teacher.reshape(-1, D).astype(jnp.float32)
    return jnp.mean(jnp.sqrt(jnp.sum((s - t + EPS) ** 2, axis=-1)))


if __name__ == "__main__":
    key = jax.random.PRNGKey(0)
    k1, k2, k3, k4, k5, k6, k7, k8 = jax.random.split(key, 8)

    # 1) Module's typical case: batch of embeddings (batch=8, hidden=32), f32.
    #    Small D triggers the lane-dense packed layout (4 original rows per 128-lane row).
    s = jax.random.normal(k1, (8, 32), dtype=jnp.float32)
    t = jax.random.normal(k2, (8, 32), dtype=jnp.float32)
    out = jax.block_until_ready(rkd_distance_loss(s, t))
    ref = _reference(s, t)
    assert jnp.allclose(out, ref, rtol=1e-5, atol=1e-6), (out, ref)

    # 2) Ragged rows / odd feature dim (un-packed path: cdiv row grid + row mask).
    s = jax.random.normal(k3, (13, 40), dtype=jnp.float32)
    t = jax.random.normal(k4, (13, 40), dtype=jnp.float32)
    out = jax.block_until_ready(rkd_distance_loss(s, t))
    ref = _reference(s, t)
    assert jnp.allclose(out, ref, rtol=1e-5, atol=1e-6), (out, ref)

    # 3) Forced feature-axis tiling with a ragged tail (multi-pass kernel + column mask).
    s = jax.random.normal(k5, (16, 300), dtype=jnp.float32)
    t = jax.random.normal(k6, (16, 300), dtype=jnp.float32)
    out = jax.block_until_ready(rkd_distance_loss(s, t, tile_d=128))
    ref = _reference(s, t)
    assert jnp.allclose(out, ref, rtol=1e-5, atol=1e-6), (out, ref)

    # 4) bf16 inputs (recommended call-site dtype: kernel is HBM-bound; math stays f32).
    s = jax.random.normal(k7, (256, 32), dtype=jnp.bfloat16)
    t = jax.random.normal(k8, (256, 32), dtype=jnp.bfloat16)
    out = jax.block_until_ready(rkd_distance_loss(s, t))
    ref = _reference(s, t)
    assert jnp.allclose(out, ref, rtol=1e-4, atol=1e-5), (out, ref)

    print("KERNEL_OK")
</pallas_src>

<mosaic_0001>
module attributes {stable_mosaic.version = 11 : i64} {
  func.func @_rkd_single_pass_kernel(%arg0: i32, %arg1: memref<2x128xf32, #tpu.memory_space<vmem>>, %arg2: memref<2x128xf32, #tpu.memory_space<vmem>>, %arg3: memref<1x1x1xf32, #tpu.memory_space<vmem>>) attributes {dimension_semantics = [#tpu.dimension_semantics<parallel>], iteration_bounds = array<i64: 1>, scalar_prefetch = 0 : i64, scratch_operands = 0 : i64, tpu.core_type = #tpu.core_type<tc>, window_params = [{transform_indices = @transform_0, window_bounds = array<i64: 2, 128>}, {transform_indices = @transform_1, window_bounds = array<i64: 2, 128>}, {transform_indices = @transform_2, window_bounds = array<i64: 1, 1, 1>}]} {
    %c0 = arith.constant 0 : index
    %c0_0 = arith.constant 0 : index
    %0 = vector.load %arg1[%c0, %c0_0] : memref<2x128xf32, #tpu.memory_space<vmem>>, vector<2x128xf32>
    %c0_1 = arith.constant 0 : index
    %c0_2 = arith.constant 0 : index
    %1 = vector.load %arg2[%c0_1, %c0_2] : memref<2x128xf32, #tpu.memory_space<vmem>>, vector<2x128xf32>
    %2 = arith.subf %0, %1 : vector<2x128xf32>
    %cst = arith.constant 9.99999997E-7 : f32
    %3 = vector.broadcast %cst : f32 to vector<2x128xf32>
    %4 = arith.addf %2, %3 : vector<2x128xf32>
    %5 = arith.mulf %4, %4 : vector<2x128xf32>
    %6 = vector.extract_strided_slice %5 {offsets = [0, 0], sizes = [2, 32], strides = [1, 1]} : vector<2x128xf32> to vector<2x32xf32>
    %cst_3 = arith.constant dense<0.000000e+00> : vector<2xf32>
    %7 = vector.multi_reduction <add>, %6, %cst_3 [1] : vector<2x32xf32> to vector<2xf32>
    %8 = vector.shape_cast %7 : vector<2xf32> to vector<2x1xf32>
    %9 = math.sqrt %8 : vector<2x1xf32>
    %10 = vector.extract_strided_slice %5 {offsets = [0, 32], sizes = [2, 32], strides = [1, 1]} : vector<2x128xf32> to vector<2x32xf32>
    %cst_4 = arith.constant dense<0.000000e+00> : vector<2xf32>
    %11 = vector.multi_reduction <add>, %10, %cst_4 [1] : vector<2x32xf32> to vector<2xf32>
    %12 = vector.shape_cast %11 : vector<2xf32> to vector<2x1xf32>
    %13 = math.sqrt %12 : vector<2x1xf32>
    %14 = arith.addf %9, %13 : vector<2x1xf32>
    %15 = vector.extract_strided_slice %5 {offsets = [0, 64], sizes = [2, 32], strides = [1, 1]} : vector<2x128xf32> to vector<2x32xf32>
    %cst_5 = arith.constant dense<0.000000e+00> : vector<2xf32>
    %16 = vector.multi_reduction <add>, %15, %cst_5 [1] : vector<2x32xf32> to vector<2xf32>
    %17 = vector.shape_cast %16 : vector<2xf32> to vector<2x1xf32>
    %18 = math.sqrt %17 : vector<2x1xf32>
    %19 = arith.addf %14, %18 : vector<2x1xf32>
    %20 = vector.extract_strided_slice %5 {offsets = [0, 96], sizes = [2, 32], strides = [1, 1]} : vector<2x128xf32> to vector<2x32xf32>
    %cst_6 = arith.constant dense<0.000000e+00> : vector<2xf32>
    %21 = vector.multi_reduction <add>, %20, %cst_6 [1] : vector<2x32xf32> to vector<2xf32>
    %22 = vector.shape_cast %21 : vector<2xf32> to vector<2x1xf32>
    %23 = math.sqrt %22 : vector<2x1xf32>
    %24 = arith.addf %19, %23 : vector<2x1xf32>
    %cst_7 = arith.constant dense<0.000000e+00> : vector<1xf32>
    %25 = vector.multi_reduction <add>, %24, %cst_7 [0] : vector<2x1xf32> to vector<1xf32>
    %26 = vector.shape_cast %25 : vector<1xf32> to vector<1x1xf32>
    %27 = vector.shape_cast %26 : vector<1x1xf32> to vector<1x1x1xf32>
    %c0_8 = arith.constant 0 : index
    %c0_9 = arith.constant 0 : index
    %c0_10 = arith.constant 0 : index
    %28 = vector.load %arg3[%c0_8, %c0_9, %c0_10] : memref<1x1x1xf32, #tpu.memory_space<vmem>>, vector<1x1x1xf32>
    tpu.vector_store %arg3[%c0_8, %c0_9, %c0_10], %27 {strides = array<i32>} : memref<1x1x1xf32, #tpu.memory_space<vmem>>, vector<1x1x1xf32>,
    return
  }
  func.func @transform_0(%arg0: i32) -> (i32, i32) {
    %c0_i32 = arith.constant 0 : i32
    %c0_i32_0 = arith.constant 0 : i32
    return %arg0, %c0_i32 : i32, i32
  }
  func.func @transform_1(%arg0: i32) -> (i32, i32) {
    %c0_i32 = arith.constant 0 : i32
    %c0_i32_0 = arith.constant 0 : i32
    return %arg0, %c0_i32 : i32, i32
  }
  func.func @transform_2(%arg0: i32) -> (i32, i32, i32) {
    %c0_i32 = arith.constant 0 : i32
    %c0_i32_0 = arith.constant 0 : i32
    %c0_i32_1 = arith.constant 0 : i32
    return %arg0, %c0_i32, %c0_i32_0 : i32, i32, i32
  }
}

</mosaic_0001>

<bundles_post_ra>
// kernel: tpu_custom_call.1
= control target key start
LH: loop header
LB: loop body
LE: loop exit
PB: predicated region body
PF: predicated region fallthrough
CT: control target
= control target key end

     0   :  { %7 = vsyncpa [#allocation3], 0  ;;  %s216_s0 = inlined_call_operand.hbm [shape: f32[2,128], index: 0, kind: input, shape index: {}]   ;;  %s217_s1 = inlined_call_operand.vmem [shape: f32[2,128], index: 1, kind: input, shape index: {}]   ;;  %s218_s2 = inlined_call_operand.hbm [shape: f32[1,1,1], index: 2, kind: output, shape index: {}]  }
   0x1   :  { %8 = vsyncpa [#allocation4], 0  ;;  %s169_s9 = smov [#allocation2]   ;;  %s121_s13 = scalar_lea.hbm %s216_s0, 32 }
   0x2   :  { %s15_s10 = sshll.u32 %s169_s9, 4  ;;  %p122_p0 = scmp.ne.s32.totalorder %s216_s0, %s121_s13  ;;  %s16_s10 = int_to_ptr.vmem [resolvable:$true] %s15_s10 }
   0x3   :  { %p125_p1 = scmp.lt.u32.totalorder %s121_s13, %s216_s0 }
   0x5   :  { %p127_p2 = pnand %p125_p1, %p122_p0 }
   0x7   :  { %130 = shalt.err (!%p127_p2)
}
   0x8   :  { %s131_s18 = scalar_lea.vmem %s16_s10, 32  ;;  %p136_p4 = scmp.lt.s32.totalorder %s16_s10, %s16_s10 }
   0x9   :  { %p132_p3 = scmp.ne.s32.totalorder %s16_s10, %s131_s18  ;;  %p137_p5 = scmp.lt.s32.totalorder %s131_s18, %s131_s18 }
   0xb   :  { %p138_p6 = por %p137_p5, %p136_p4 }
   0xd   :  { %p139_p7 = pnand %p138_p6, %p132_p3 }
   0xf   :  { %142 = shalt.err (!%p139_p7)
}
  0x10   :  { %18 = dma.hbm_to_vmem [thread:$0]  %s216_s0, 32, %s16_s10, [#allocation3]  }
  0x11   :  { %165 = dma.done.wait [#allocation3], 32  }
  0x12   :  { %166 = vsyncadd [#allocation3], 4294967264  ;;  %v24_v0 = vld [vmem:[#allocation2] sm:$0x3]  ;;  %s170_s23 = smov 32   ;;  %s171_s24 = smov 96  }
  0x13   :  { %v25_v1 = vld [vmem:[%s217_s1] sm:$0x3]  ;;  %s172_s25 = smov 64   ;;  %vm29_vm0 = vcmask 254976   ;;  %vm83_vm9 = vcmask 1041408   ;;  %s173_s0 = smov [#allocation5]  }
  0x14   :  { %v26_v2 = vsub.f32 %v24_v0, %v25_v1  ;;  %s99_s1 = sshll.u32 %s173_s0, 4  ;;  %vm91_vm10 = vcmask 0   ;;  %s100_s1 = int_to_ptr.vmem [resolvable:$true] %s99_s1 }
  0x15   :  { %s143_s26 = scalar_lea.vmem %s100_s1, 16  ;;  %s147_s27 = scalar_lea.vmem %s100_s1, 32 }
  0x16   :  { %v27_v3 = vadd.f32 1e-06, %v26_v2  ;;  %p144_p8 = scmp.ne.s32.totalorder %s100_s1, %s143_s26  ;;  %p148_p9 = scmp.lt.s32.totalorder %s100_s1, %s100_s1 }
  0x17   :  { %p149_p10 = scmp.lt.s32.totalorder %s147_s27, %s143_s26 }
  0x18   :  { %v28_v4 = vmul.f32 %v27_v3, %v27_v3 }
  0x19   :  { %p150_p11 = por %p149_p10, %p148_p9 }
  0x1a   :  { %69 = vrot.lane.b32.xlu1 %v28_v4, %s170_s23  ;;  %41 = vrot.lane.b32.xlu0 %v28_v4, %s171_s24  ;;  %v30_v5 = vsel %vm29_vm0, %v28_v4, 0.0 }
  0x1b   :  { %p151_p12 = pnand %p150_p11, %p144_p8 }
  0x1e   :  { %55 = vrot.lane.b32.xlu0 %v28_v4, %s172_s25 }
  0x3e   :  { %31 = vadd.xlane.f32.xlu1 %v30_v5 }
  0x8c   :  { %v70_v6 = vpop.permute.xlu1 %69  ;;  %v42_v7 = vpop.permute.xlu0 %41 }
  0x8d   :  { %v44_v8 = vsel %vm29_vm0, %v42_v7, 0.0  ;;  %v72_v9 = vsel %vm29_vm0, %v70_v6, 0.0 }
  0x8e   :  { %45 = vadd.xlane.f32.xlu0 %v44_v8  ;;  %73 = vadd.xlane.f32.xlu1 %v72_v9 }
  0x90   :  { %v56_v10 = vpop.permute.xlu0 %55 }
  0x91   :  { %v58_v11 = vsel %vm29_vm0, %v56_v10, 0.0 }
  0x92   :  { %59 = vadd.xlane.f32.xlu0 %v58_v11 }
  0xcb   :  { %v32_v12 = vpop.xlane.xlu1 %31 }
  0xcc   :  { %113 = vrsqrt.f32 %v32_v12  ;;  %vm35_vm1 = vcmp.eq.f32.partialorder %v32_v12, inf  ;;  %vm37_vm2 = vcmp.eq.f32.partialorder %v32_v12, 0.0  ;;  %v38_v21 = vand.u32 2147483648, %v32_v12 }
  0xd6   :  { %v114_v16 = vpop.eup %113 }
  0xd7   :  { %v34_v17 = vmul.f32 %v114_v16, %v32_v12 }
  0xd9   :  { %v36_v23 = vsel %vm35_vm1, %v32_v12, %v34_v17 }
  0xda   :  { %v39_v29 = vsel %vm37_vm2, %v38_v21, %v36_v23 }
 0x11b   :  { %v46_v13 = vpop.xlane.xlu0 %45  ;;  %v74_v14 = vpop.xlane.xlu1 %73 }
 0x11c   :  { %115 = vrsqrt.f32 %v46_v13  ;;  %vm49_vm3 = vcmp.eq.f32.partialorder %v46_v13, inf  ;;  %v52_v22 = vand.u32 2147483648, %v46_v13  ;;  %vm51_vm4 = vcmp.eq.f32.partialorder %v46_v13, 0.0 }
 0x11d   :  { %117 = vrsqrt.f32 %v74_v14  ;;  %vm77_vm5 = vcmp.eq.f32.partialorder %v74_v14, inf  ;;  %v80_v34 = vand.u32 2147483648, %v74_v14  ;;  %vm79_vm8 = vcmp.eq.f32.partialorder %v74_v14, 0.0 }
 0x11f   :  { %v60_v15 = vpop.xlane.xlu0 %59 }
 0x120   :  { %119 = vrsqrt.f32 %v60_v15  ;;  %vm63_vm6 = vcmp.eq.f32.partialorder %v60_v15, inf  ;;  %v66_v30 = vand.u32 2147483648, %v60_v15  ;;  %vm65_vm7 = vcmp.eq.f32.partialorder %v60_v15, 0.0 }
 0x126   :  { %v116_v18 = vpop.eup %115 }
 0x127   :  { %v118_v19 = vpop.eup %117  ;;  %v48_v20 = vmul.f32 %v116_v18, %v46_v13 }
 0x128   :  { %v76_v25 = vmul.f32 %v118_v19, %v74_v14 }
 0x129   :  { %v50_v24 = vsel %vm49_vm3, %v46_v13, %v48_v20 }
 0x12a   :  { %v120_v26 = vpop.eup %119  ;;  %v53_v27 = vsel %vm51_vm4, %v52_v22, %v50_v24  ;;  %v78_v31 = vsel %vm77_vm5, %v74_v14, %v76_v25 }
 0x12b   :  { %v62_v28 = vmul.f32 %v120_v26, %v60_v15  ;;  %v54_v32 = vadd.f32 %v53_v27, %v39_v29  ;;  %v81_v37 = vsel %vm79_vm8, %v80_v34, %v78_v31 }
 0x12d   :  { %v64_v33 = vsel %vm63_vm6, %v60_v15, %v62_v28 }
 0x12e   :  { %v67_v35 = vsel %vm65_vm7, %v66_v30, %v64_v33 }
 0x12f   :  { %v68_v36 = vadd.f32 %v67_v35, %v54_v32 }
 0x131   :  { %v82_v38 = vadd.f32 %v81_v37, %v68_v36 }
 0x133   :  { %v84_v39 = vsel %vm83_vm9, %v82_v38, 0.0 }
 0x134   :  { %v85_v40 = vrot.slane %v84_v39, 4 }
 0x136   :  { %v86_v41 = vadd.f32 %v85_v40, %v84_v39 }
 0x138   :  { %v87_v42 = vrot.slane %v86_v41, 2 }
 0x13a   :  { %v88_v43 = vadd.f32 %v87_v42, %v86_v41 }
 0x13c   :  { %v89_v44 = vrot.slane %v88_v43, 1 }
 0x13e   :  { %v90_v45 = vadd.f32 %v89_v44, %v88_v43 }
 0x140   :  { %92 = vst.msk [vmem:[#allocation5] sm:$0x1] %vm91_vm10, %v90_v45 }
 0x141   :  { %154 = shalt.err (!%p151_p12)
}
 0x142   :  { %s155_s30 = scalar_lea.hbm %s218_s2, 16 }
 0x143   :  { %p156_p13 = scmp.ne.s32.totalorder %s218_s2, %s155_s30  ;;  %p159_p0 = scmp.lt.u32.totalorder %s155_s30, %s218_s2 }
 0x145   :  { %p161_p1 = pnand %p159_p0, %p156_p13 }
 0x147   :  { %164 = shalt.err (!%p161_p1)
}
 0x148   :  { %102 = dma.vmem_to_hbm [thread:$0]  %s100_s1, 16, %s218_s2, [#allocation4]  }
 0x149   :  { %167 = dma.done.wait [#allocation4], 16  }
 0x14a   :  { %168 = vsyncadd [#allocation4], 4294967280 }
 0x14b   :  { %106 = vsyncpa [#allocation3], 1 }
 0x14c   :  { %107 = vsyncpa [#allocation4], 1 }

</bundles_post_ra>
